<compile_context>
chip_gen: v7x
topology: tpu7x:2x2x1
jax: 0.10.0
libtpu: 0.0.40
codegen_flags: <defaults>
</compile_context>

<pallas_src>
import functools

import jax
import jax.numpy as jnp
from jax.experimental import pallas as pl
from jax.experimental.pallas import tpu as pltpu

_LANE = 128      # vreg lane width (last dim)
_SUBLANE = 8     # f32 sublane count (second-to-last dim)


def _round_up(x, m):
    return (x + m - 1) // m * m


def _leaky_relu(x, slope=0.01):
    return jnp.where(x > 0, x, slope * x)


def _mlp_kernel(x_ref, w1_ref, b1_ref, w2_ref, b2_ref,
                w3_ref, b3_ref, w4_ref, b4_ref, o_ref, *, apply_tanh):
    # bf16 operands feed the MXU; bias add / leaky_relu run in f32 on the VPU.
    x = x_ref[...].astype(jnp.bfloat16)

    h = jnp.dot(x, w1_ref[...], preferred_element_type=jnp.float32) + b1_ref[...]
    h = _leaky_relu(h)

    h = jnp.dot(h.astype(jnp.bfloat16), w2_ref[...],
                preferred_element_type=jnp.float32) + b2_ref[...]
    h = _leaky_relu(h)

    h = jnp.dot(h.astype(jnp.bfloat16), w3_ref[...],
                preferred_element_type=jnp.float32) + b3_ref[...]
    h = _leaky_relu(h)

    out = jnp.dot(h.astype(jnp.bfloat16), w4_ref[...],
                  preferred_element_type=jnp.float32) + b4_ref[...]
    if apply_tanh:                       # constrain_out=True path (EUP tanh)
        out = jnp.tanh(out)
    o_ref[...] = out.astype(o_ref.dtype)


def init_params(key, input_dim, out_dim, hidden_dim=64):
    """nn.Linear-style init (U(-1/sqrt(fan_in), +)), logical (unpadded) shapes.

    Weights are stored pre-transposed as [in_features, out_features]; biases
    as [1, out_features].
    """
    dims = [(input_dim, hidden_dim), (hidden_dim, hidden_dim),
            (hidden_dim, hidden_dim), (hidden_dim, out_dim)]
    params = {}
    keys = jax.random.split(key, 2 * len(dims))
    for idx, (fan_in, fan_out) in enumerate(dims):
        bound = 1.0 / jnp.sqrt(jnp.float32(fan_in))
        params[f"w{idx + 1}"] = jax.random.uniform(
            keys[2 * idx], (fan_in, fan_out),
            minval=-bound, maxval=bound, dtype=jnp.float32)
        params[f"b{idx + 1}"] = jax.random.uniform(
            keys[2 * idx + 1], (1, fan_out),
            minval=-bound, maxval=bound, dtype=jnp.float32)
    return params


def pad_params(params):
    """Zero-pad all dims to 128-lane multiples; weights -> bf16, biases -> f32."""
    padded = {}
    for i in range(1, 5):
        w = params[f"w{i}"]
        b = params[f"b{i}"]
        pi = _round_up(w.shape[0], _LANE)
        po = _round_up(w.shape[1], _LANE)
        padded[f"w{i}"] = jnp.pad(
            w, ((0, pi - w.shape[0]), (0, po - w.shape[1]))).astype(jnp.bfloat16)
        padded[f"b{i}"] = jnp.pad(
            b, ((0, 0), (0, po - b.shape[1]))).astype(jnp.float32)
    return padded


def _resident_spec(arr):
    # Weights/biases: same block every grid step -> stay VMEM-resident.
    # NOTE: bind ndim via a default arg (fixes the late-binding closure bug).
    return pl.BlockSpec(arr.shape, lambda i, _n=arr.ndim: (0,) * _n)


def mlp_forward(x, padded_params, out_dim, *, constrain_out=False, tile_b=256):
    """x: [B, input_dim] (unpadded); padded_params from pad_params().

    Returns [B, out_dim] float32.
    """
    B, in_dim = x.shape
    w1, w2, w3, w4 = (padded_params[f"w{i}"] for i in range(1, 5))
    b1, b2, b3, b4 = (padded_params[f"b{i}"] for i in range(1, 5))
    in_pad, h_pad = w1.shape
    out_pad = w4.shape[1]
    assert in_dim <= in_pad and out_dim <= out_pad

    # Batch tile: multiple of the f32 sublane (8); large tiles fill the MXU M dim.
    tile_b = min(tile_b, _round_up(B, _SUBLANE))
    grid_b = pl.cdiv(B, tile_b)
    b_pad = grid_b * tile_b

    x_p = jnp.pad(x.astype(jnp.float32),
                  ((0, b_pad - B), (0, in_pad - in_dim)))

    operands = (x_p, w1, b1, w2, b2, w3, b3, w4, b4)

    x_spec = pl.BlockSpec((tile_b, in_pad), lambda i: (i, 0))
    weight_specs = [_resident_spec(a) for a in operands[1:]]
    out_spec = pl.BlockSpec((tile_b, out_pad), lambda i: (i, 0))

    flops = 2 * b_pad * (in_pad * h_pad + 2 * h_pad * h_pad + h_pad * out_pad)
    bytes_accessed = int(sum(a.size * a.dtype.itemsize for a in operands)
                         + b_pad * out_pad * 4)
    transcendentals = b_pad * out_pad if constrain_out else 0

    out_padded = pl.pallas_call(
        functools.partial(_mlp_kernel, apply_tanh=constrain_out),
        out_shape=jax.ShapeDtypeStruct((b_pad, out_pad), jnp.float32),
        grid_spec=pltpu.PrefetchScalarGridSpec(
            num_scalar_prefetch=0,
            grid=(grid_b,),
            in_specs=[x_spec] + weight_specs,
            out_specs=out_spec,
        ),
        compiler_params=pltpu.CompilerParams(
            dimension_semantics=("parallel",)),
        cost_estimate=pl.CostEstimate(
            flops=flops,
            transcendentals=transcendentals,
            bytes_accessed=bytes_accessed),
    )(*operands)

    return out_padded[:B, :out_dim]


def reference_forward(x, params, *, cast_bf16):
    """Pure-JAX reference.  cast_bf16=True mirrors the kernel's MXU dtypes."""
    def mm(a, w):
        if cast_bf16:
            a = a.astype(jnp.bfloat16)
            w = w.astype(jnp.bfloat16)
        return jnp.dot(a, w, preferred_element_type=jnp.float32)

    h = x.astype(jnp.float32)
    for i in range(1, 4):
        h = _leaky_relu(mm(h, params[f"w{i}"]) + params[f"b{i}"])
    return mm(h, params["w4"]) + params["b4"]


if __name__ == "__main__":
    key = jax.random.PRNGKey(0)
    k_x, k_p, k_x2 = jax.random.split(key, 3)

    batch, input_dim, hidden_dim, out_dim = 8, 16, 64, 8
    params = init_params(k_p, input_dim, out_dim, hidden_dim)
    padded = pad_params(params)

    # Small shape (single grid step).
    x = jax.random.normal(k_x, (batch, input_dim), dtype=jnp.float32)
    out = jax.block_until_ready(mlp_forward(x, padded, out_dim))
    assert out.shape == (batch, out_dim)

    ref_bf16 = reference_forward(x, params, cast_bf16=True)
    ref_f32 = reference_forward(x, params, cast_bf16=False)
    assert jnp.allclose(out, ref_bf16, atol=2e-3, rtol=2e-3), "mismatch vs bf16 reference"
    assert jnp.allclose(out, ref_f32, atol=5e-2, rtol=5e-2), "mismatch vs f32 reference"

    # Larger, non-multiple batch: exercises batch tiling + padding (grid > 1).
    x2 = jax.random.normal(k_x2, (300, input_dim), dtype=jnp.float32)
    out2 = jax.block_until_ready(mlp_forward(x2, padded, out_dim))
    ref2 = reference_forward(x2, params, cast_bf16=True)
    assert out2.shape == (300, out_dim)
    assert jnp.allclose(out2, ref2, atol=2e-3, rtol=2e-3), "mismatch vs reference (tiled)"

    print("KERNEL_OK")
</pallas_src>

<mosaic_0001>
module attributes {stable_mosaic.version = 11 : i64} {
  func.func @_mlp_kernel(%arg0: i32, %arg1: memref<8x128xf32, #tpu.memory_space<vmem>>, %arg2: memref<128x128xbf16, #tpu.memory_space<vmem>>, %arg3: memref<1x128xf32, #tpu.memory_space<vmem>>, %arg4: memref<128x128xbf16, #tpu.memory_space<vmem>>, %arg5: memref<1x128xf32, #tpu.memory_space<vmem>>, %arg6: memref<128x128xbf16, #tpu.memory_space<vmem>>, %arg7: memref<1x128xf32, #tpu.memory_space<vmem>>, %arg8: memref<128x128xbf16, #tpu.memory_space<vmem>>, %arg9: memref<1x128xf32, #tpu.memory_space<vmem>>, %arg10: memref<8x128xf32, #tpu.memory_space<vmem>>) attributes {dimension_semantics = [#tpu.dimension_semantics<parallel>], iteration_bounds = array<i64: 1>, scalar_prefetch = 0 : i64, scratch_operands = 0 : i64, tpu.core_type = #tpu.core_type<tc>, window_params = [{transform_indices = @transform_0, window_bounds = array<i64: 8, 128>}, {pipeline_mode = #tpu.pipeline_mode<synchronous>, transform_indices = @transform_1, window_bounds = array<i64: 128, 128>}, {pipeline_mode = #tpu.pipeline_mode<synchronous>, transform_indices = @transform_2, window_bounds = array<i64: 1, 128>}, {pipeline_mode = #tpu.pipeline_mode<synchronous>, transform_indices = @transform_3, window_bounds = array<i64: 128, 128>}, {pipeline_mode = #tpu.pipeline_mode<synchronous>, transform_indices = @transform_4, window_bounds = array<i64: 1, 128>}, {pipeline_mode = #tpu.pipeline_mode<synchronous>, transform_indices = @transform_5, window_bounds = array<i64: 128, 128>}, {pipeline_mode = #tpu.pipeline_mode<synchronous>, transform_indices = @transform_6, window_bounds = array<i64: 1, 128>}, {pipeline_mode = #tpu.pipeline_mode<synchronous>, transform_indices = @transform_7, window_bounds = array<i64: 128, 128>}, {pipeline_mode = #tpu.pipeline_mode<synchronous>, transform_indices = @transform_8, window_bounds = array<i64: 1, 128>}, {transform_indices = @transform_9, window_bounds = array<i64: 8, 128>}]} {
    %c0 = arith.constant 0 : index
    %c0_0 = arith.constant 0 : index
    %0 = vector.load %arg1[%c0, %c0_0] : memref<8x128xf32, #tpu.memory_space<vmem>>, vector<8x128xf32>
    %1 = arith.truncf %0 : vector<8x128xf32> to vector<8x128xbf16>
    %c0_1 = arith.constant 0 : index
    %c0_2 = arith.constant 0 : index
    %2 = vector.load %arg2[%c0_1, %c0_2] : memref<128x128xbf16, #tpu.memory_space<vmem>>, vector<128x128xbf16>
    %cst = arith.constant dense<0.000000e+00> : vector<8x128xf32>
    %3 = tpu.matmul %1, %2, %cst {dimension_numbers = #tpu.dot_dimension_numbers<[1], [0], [0], [1], [0, 0, 1, 1], [], []>} : vector<8x128xbf16>, vector<128x128xbf16>, vector<8x128xf32> -> vector<8x128xf32>
    %c0_3 = arith.constant 0 : index
    %c0_4 = arith.constant 0 : index
    %4 = vector.load %arg3[%c0_3, %c0_4] : memref<1x128xf32, #tpu.memory_space<vmem>>, vector<1x128xf32>
    %5 = vector.broadcast %4 : vector<1x128xf32> to vector<8x128xf32>
    %6 = arith.addf %3, %5 : vector<8x128xf32>
    %cst_5 = arith.constant 0.000000e+00 : f32
    %7 = vector.broadcast %cst_5 : f32 to vector<8x128xf32>
    %8 = arith.cmpf ogt, %6, %7 : vector<8x128xf32>
    %cst_6 = arith.constant 0.00999999977 : f32
    %9 = vector.broadcast %cst_6 : f32 to vector<8x128xf32>
    %10 = arith.mulf %9, %6 : vector<8x128xf32>
    %11 = arith.select %8, %6, %10 : vector<8x128xi1>, vector<8x128xf32>
    %12 = arith.truncf %11 : vector<8x128xf32> to vector<8x128xbf16>
    %c0_7 = arith.constant 0 : index
    %c0_8 = arith.constant 0 : index
    %13 = vector.load %arg4[%c0_7, %c0_8] : memref<128x128xbf16, #tpu.memory_space<vmem>>, vector<128x128xbf16>
    %cst_9 = arith.constant dense<0.000000e+00> : vector<8x128xf32>
    %14 = tpu.matmul %12, %13, %cst_9 {dimension_numbers = #tpu.dot_dimension_numbers<[1], [0], [0], [1], [0, 0, 1, 1], [], []>} : vector<8x128xbf16>, vector<128x128xbf16>, vector<8x128xf32> -> vector<8x128xf32>
    %c0_10 = arith.constant 0 : index
    %c0_11 = arith.constant 0 : index
    %15 = vector.load %arg5[%c0_10, %c0_11] : memref<1x128xf32, #tpu.memory_space<vmem>>, vector<1x128xf32>
    %16 = vector.broadcast %15 : vector<1x128xf32> to vector<8x128xf32>
    %17 = arith.addf %14, %16 : vector<8x128xf32>
    %cst_12 = arith.constant 0.000000e+00 : f32
    %18 = vector.broadcast %cst_12 : f32 to vector<8x128xf32>
    %19 = arith.cmpf ogt, %17, %18 : vector<8x128xf32>
    %cst_13 = arith.constant 0.00999999977 : f32
    %20 = vector.broadcast %cst_13 : f32 to vector<8x128xf32>
    %21 = arith.mulf %20, %17 : vector<8x128xf32>
    %22 = arith.select %19, %17, %21 : vector<8x128xi1>, vector<8x128xf32>
    %23 = arith.truncf %22 : vector<8x128xf32> to vector<8x128xbf16>
    %c0_14 = arith.constant 0 : index
    %c0_15 = arith.constant 0 : index
    %24 = vector.load %arg6[%c0_14, %c0_15] : memref<128x128xbf16, #tpu.memory_space<vmem>>, vector<128x128xbf16>
    %cst_16 = arith.constant dense<0.000000e+00> : vector<8x128xf32>
    %25 = tpu.matmul %23, %24, %cst_16 {dimension_numbers = #tpu.dot_dimension_numbers<[1], [0], [0], [1], [0, 0, 1, 1], [], []>} : vector<8x128xbf16>, vector<128x128xbf16>, vector<8x128xf32> -> vector<8x128xf32>
    %c0_17 = arith.constant 0 : index
    %c0_18 = arith.constant 0 : index
    %26 = vector.load %arg7[%c0_17, %c0_18] : memref<1x128xf32, #tpu.memory_space<vmem>>, vector<1x128xf32>
    %27 = vector.broadcast %26 : vector<1x128xf32> to vector<8x128xf32>
    %28 = arith.addf %25, %27 : vector<8x128xf32>
    %cst_19 = arith.constant 0.000000e+00 : f32
    %29 = vector.broadcast %cst_19 : f32 to vector<8x128xf32>
    %30 = arith.cmpf ogt, %28, %29 : vector<8x128xf32>
    %cst_20 = arith.constant 0.00999999977 : f32
    %31 = vector.broadcast %cst_20 : f32 to vector<8x128xf32>
    %32 = arith.mulf %31, %28 : vector<8x128xf32>
    %33 = arith.select %30, %28, %32 : vector<8x128xi1>, vector<8x128xf32>
    %34 = arith.truncf %33 : vector<8x128xf32> to vector<8x128xbf16>
    %c0_21 = arith.constant 0 : index
    %c0_22 = arith.constant 0 : index
    %35 = vector.load %arg8[%c0_21, %c0_22] : memref<128x128xbf16, #tpu.memory_space<vmem>>, vector<128x128xbf16>
    %cst_23 = arith.constant dense<0.000000e+00> : vector<8x128xf32>
    %36 = tpu.matmul %34, %35, %cst_23 {dimension_numbers = #tpu.dot_dimension_numbers<[1], [0], [0], [1], [0, 0, 1, 1], [], []>} : vector<8x128xbf16>, vector<128x128xbf16>, vector<8x128xf32> -> vector<8x128xf32>
    %c0_24 = arith.constant 0 : index
    %c0_25 = arith.constant 0 : index
    %37 = vector.load %arg9[%c0_24, %c0_25] : memref<1x128xf32, #tpu.memory_space<vmem>>, vector<1x128xf32>
    %38 = vector.broadcast %37 : vector<1x128xf32> to vector<8x128xf32>
    %39 = arith.addf %36, %38 : vector<8x128xf32>
    %c0_26 = arith.constant 0 : index
    %c0_27 = arith.constant 0 : index
    %40 = vector.load %arg10[%c0_26, %c0_27] : memref<8x128xf32, #tpu.memory_space<vmem>>, vector<8x128xf32>
    tpu.vector_store %arg10[%c0_26, %c0_27], %39 {strides = array<i32>} : memref<8x128xf32, #tpu.memory_space<vmem>>, vector<8x128xf32>,
    return
  }
  func.func @transform_0(%arg0: i32) -> (i32, i32) {
    %c0_i32 = arith.constant 0 : i32
    %c0_i32_0 = arith.constant 0 : i32
    return %arg0, %c0_i32 : i32, i32
  }
  func.func @transform_1(%arg0: i32) -> (i32, i32) {
    %c0_i32 = arith.constant 0 : i32
    %c0_i32_0 = arith.constant 0 : i32
    %c0_i32_1 = arith.constant 0 : i32
    return %c0_i32, %c0_i32_0 : i32, i32
  }
  func.func @transform_2(%arg0: i32) -> (i32, i32) {
    %c0_i32 = arith.constant 0 : i32
    %c0_i32_0 = arith.constant 0 : i32
    %c0_i32_1 = arith.constant 0 : i32
    return %c0_i32, %c0_i32_0 : i32, i32
  }
  func.func @transform_3(%arg0: i32) -> (i32, i32) {
    %c0_i32 = arith.constant 0 : i32
    %c0_i32_0 = arith.constant 0 : i32
    %c0_i32_1 = arith.constant 0 : i32
    return %c0_i32, %c0_i32_0 : i32, i32
  }
  func.func @transform_4(%arg0: i32) -> (i32, i32) {
    %c0_i32 = arith.constant 0 : i32
    %c0_i32_0 = arith.constant 0 : i32
    %c0_i32_1 = arith.constant 0 : i32
    return %c0_i32, %c0_i32_0 : i32, i32
  }
  func.func @transform_5(%arg0: i32) -> (i32, i32) {
    %c0_i32 = arith.constant 0 : i32
    %c0_i32_0 = arith.constant 0 : i32
    %c0_i32_1 = arith.constant 0 : i32
    return %c0_i32, %c0_i32_0 : i32, i32
  }
  func.func @transform_6(%arg0: i32) -> (i32, i32) {
    %c0_i32 = arith.constant 0 : i32
    %c0_i32_0 = arith.constant 0 : i32
    %c0_i32_1 = arith.constant 0 : i32
    return %c0_i32, %c0_i32_0 : i32, i32
  }
  func.func @transform_7(%arg0: i32) -> (i32, i32) {
    %c0_i32 = arith.constant 0 : i32
    %c0_i32_0 = arith.constant 0 : i32
    %c0_i32_1 = arith.constant 0 : i32
    return %c0_i32, %c0_i32_0 : i32, i32
  }
  func.func @transform_8(%arg0: i32) -> (i32, i32) {
    %c0_i32 = arith.constant 0 : i32
    %c0_i32_0 = arith.constant 0 : i32
    %c0_i32_1 = arith.constant 0 : i32
    return %c0_i32, %c0_i32_0 : i32, i32
  }
  func.func @transform_9(%arg0: i32) -> (i32, i32) {
    %c0_i32 = arith.constant 0 : i32
    %c0_i32_0 = arith.constant 0 : i32
    return %arg0, %c0_i32 : i32, i32
  }
}

</mosaic_0001>

<bundles_post_ra>
// kernel: tpu_custom_call.1
= control target key start
LH: loop header
LB: loop body
LE: loop exit
PB: predicated region body
PF: predicated region fallthrough
CT: control target
= control target key end

     0   :  { %14 = vsyncpa [#allocation3], 0  ;;  %s1106_s0 = inlined_call_operand.hbm [shape: f32[8,128], index: 0, kind: input, shape index: {}]   ;;  %s1107_s1 = inlined_call_operand.hbm [shape: bf16[128,128], index: 1, kind: input, shape index: {}]   ;;  %s1108_s2 = inlined_call_operand.vmem [shape: f32[1,128], index: 2, kind: input, shape index: {}]   ;;  %s1109_s3 = inlined_call_operand.hbm [shape: bf16[128,128], index: 3, kind: input, shape index: {}]   ;;  %s1110_s4 = inlined_call_operand.vmem [shape: f32[1,128], index: 4, kind: input, shape index: {}]   ;;  %s1111_s5 = inlined_call_operand.hbm [shape: bf16[128,128], index: 5, kind: input, shape index: {}]   ;;  %s1112_s6 = inlined_call_operand.vmem [shape: f32[1,128], index: 6, kind: input, shape index: {}]   ;;  %s1113_s7 = inlined_call_operand.hbm [shape: bf16[128,128], index: 7, kind: input, shape index: {}]   ;;  %s1114_s8 = inlined_call_operand.vmem [shape: f32[1,128], index: 8, kind: input, shape index: {}]   ;;  %s1115_s9 = inlined_call_operand.hbm [shape: f32[8,128], index: 9, kind: output, shape index: {}]  }
   0x1   :  { %15 = vsyncpa [#allocation6], 0 }
   0x2   :  { %16 = vsyncpa [#allocation9], 0 }
   0x3   :  { %17 = vsyncpa [#allocation4], 0  ;;  %s910_s30 = smov [#allocation5]   ;;  %s770_s13 = scalar_lea.hbm %s1107_s1, 1024 }
   0x4   :  { %s33_s10 = sshll.u32 %s910_s30, 4  ;;  %p771_p0 = scmp.ne.s32.totalorder %s1107_s1, %s770_s13  ;;  %s34_s10 = int_to_ptr.vmem [resolvable:$true] %s33_s10 }
   0x5   :  { %p774_p1 = scmp.lt.u32.totalorder %s770_s13, %s1107_s1 }
   0x7   :  { %p776_p2 = pnand %p774_p1, %p771_p0 }
   0x9   :  { %779 = shalt.err (!%p776_p2)
}
   0xa   :  { %s780_s18 = scalar_lea.vmem %s34_s10, 1024  ;;  %p785_p4 = scmp.lt.s32.totalorder %s34_s10, %s34_s10 }
   0xb   :  { %p781_p3 = scmp.ne.s32.totalorder %s34_s10, %s780_s18  ;;  %p786_p5 = scmp.lt.s32.totalorder %s780_s18, %s780_s18 }
   0xd   :  { %p787_p6 = por %p786_p5, %p785_p4 }
   0xf   :  { %p788_p7 = pnand %p787_p6, %p781_p3 }
  0x11   :  { %791 = shalt.err (!%p788_p7)
}
  0x12   :  { %s911_s19 = smov 64   ;;  %s912_s20 = smov 4  }
  0x13   :  { %39 = dma.hbm_to_vmem [thread:$0]  %s1107_s1, 1024, %s34_s10, [#allocation6], %s911_s19, %s911_s19, %s912_s20  }
  0x14   :  { %s913_s23 = smov [#allocation8]   ;;  %s914_s25 = smov [#allocation2]  }
  0x15   :  { %s61_s24 = sshll.u32 %s913_s23, 4  ;;  %s24_s26 = sshll.u32 %s914_s25, 4  ;;  %s62_s24 = int_to_ptr.vmem [resolvable:$true] %s61_s24  ;;  %s25_s26 = int_to_ptr.vmem [resolvable:$true] %s24_s26 }
  0x16   :  { %s792_s29 = scalar_lea.hbm %s1111_s5, 1024 }
  0x17   :  { %p793_p8 = scmp.ne.s32.totalorder %s1111_s5, %s792_s29  ;;  %p796_p9 = scmp.lt.u32.totalorder %s792_s29, %s1111_s5 }
  0x19   :  { %p798_p10 = pnand %p796_p9, %p793_p8 }
  0x1b   :  { %801 = shalt.err (!%p798_p10)
}
  0x1c   :  { %s802_s1 = scalar_lea.vmem %s62_s24, 1024  ;;  %p807_p12 = scmp.lt.s32.totalorder %s62_s24, %s62_s24 }
  0x1d   :  { %p803_p11 = scmp.ne.s32.totalorder %s62_s24, %s802_s1  ;;  %p808_p13 = scmp.lt.s32.totalorder %s802_s1, %s802_s1 }
  0x1f   :  { %p809_p0 = por %p808_p13, %p807_p12 }
  0x21   :  { %p810_p1 = pnand %p809_p0, %p803_p11 }
  0x23   :  { %813 = shalt.err (!%p810_p1)
}
  0x24   :  { %67 = dma.hbm_to_vmem [thread:$0]  %s1111_s5, 1024, %s62_s24, [#allocation9], %s911_s19, %s911_s19, %s912_s20  }
  0x25   :  { %s814_s17 = scalar_lea.hbm %s1106_s0, 128 }
  0x26   :  { %p815_p2 = scmp.ne.s32.totalorder %s1106_s0, %s814_s17  ;;  %p818_p3 = scmp.lt.u32.totalorder %s814_s17, %s1106_s0 }
  0x28   :  { %p820_p4 = pnand %p818_p3, %p815_p2 }
  0x2a   :  { %823 = shalt.err (!%p820_p4)
}
  0x2b   :  { %s824_s25 = scalar_lea.vmem %s25_s26, 128  ;;  %p829_p6 = scmp.lt.s32.totalorder %s25_s26, %s25_s26 }
  0x2c   :  { %p825_p5 = scmp.ne.s32.totalorder %s25_s26, %s824_s25  ;;  %p830_p7 = scmp.lt.s32.totalorder %s824_s25, %s824_s25 }
  0x2e   :  { %p831_p8 = por %p830_p7, %p829_p6 }
  0x30   :  { %p832_p9 = pnand %p831_p8, %p825_p5 }
  0x32   :  { %835 = shalt.err (!%p832_p9)
}
  0x33   :  { %27 = dma.hbm_to_vmem [thread:$0]  %s1106_s0, 128, %s25_s26, [#allocation3]  }
  0x34   :  { %s915_s27 = smov [#allocation7]   ;;  %s916_s29 = smov [#allocation10]  }
  0x35   :  { %s47_s28 = sshll.u32 %s915_s27, 4  ;;  %s75_s30 = sshll.u32 %s916_s29, 4  ;;  %s48_s28 = int_to_ptr.vmem [resolvable:$true] %s47_s28  ;;  %s76_s30 = int_to_ptr.vmem [resolvable:$true] %s75_s30 }
  0x36   :  { %s836_s13 = scalar_lea.hbm %s1109_s3, 1024 }
  0x37   :  { %p837_p10 = scmp.ne.s32.totalorder %s1109_s3, %s836_s13  ;;  %p840_p11 = scmp.lt.u32.totalorder %s836_s13, %s1109_s3 }
  0x39   :  { %p842_p12 = pnand %p840_p11, %p837_p10 }
  0x3b   :  { %845 = shalt.err (!%p842_p12)
}
  0x3c   :  { %s846_s0 = scalar_lea.vmem %s48_s28, 1024  ;;  %p851_p0 = scmp.lt.s32.totalorder %s48_s28, %s48_s28 }
  0x3d   :  { %p847_p13 = scmp.ne.s32.totalorder %s48_s28, %s846_s0  ;;  %p852_p1 = scmp.lt.s32.totalorder %s846_s0, %s846_s0 }
  0x3f   :  { %p853_p2 = por %p852_p1, %p851_p0 }
  0x41   :  { %p854_p3 = pnand %p853_p2, %p847_p13 }
  0x43   :  { %857 = shalt.err (!%p854_p3)
}
  0x44   :  { %53 = dma.hbm_to_vmem [thread:$0]  %s1109_s3, 1024, %s48_s28, [#allocation6], %s911_s19, %s911_s19, %s912_s20  }
  0x45   :  { %s858_s21 = scalar_lea.hbm %s1113_s7, 1024 }
  0x46   :  { %p859_p4 = scmp.ne.s32.totalorder %s1113_s7, %s858_s21  ;;  %p862_p5 = scmp.lt.u32.totalorder %s858_s21, %s1113_s7 }
  0x48   :  { %p864_p6 = pnand %p862_p5, %p859_p4 }
  0x4a   :  { %867 = shalt.err (!%p864_p6)
}
  0x4b   :  { %s868_s24 = scalar_lea.vmem %s76_s30, 1024  ;;  %p873_p8 = scmp.lt.s32.totalorder %s76_s30, %s76_s30 }
  0x4c   :  { %p869_p7 = scmp.ne.s32.totalorder %s76_s30, %s868_s24  ;;  %p874_p9 = scmp.lt.s32.totalorder %s868_s24, %s868_s24 }
  0x4e   :  { %p875_p10 = por %p874_p9, %p873_p8 }
  0x50   :  { %p876_p11 = pnand %p875_p10, %p869_p7 }
  0x52   :  { %879 = shalt.err (!%p876_p11)
}
  0x53   :  { %81 = dma.hbm_to_vmem [thread:$0]  %s1113_s7, 1024, %s76_s30, [#allocation9], %s911_s19, %s911_s19, %s912_s20  }
  0x54   :  { %902 = dma.done.wait [#allocation3], 128  }
  0x55   :  { %903 = vsyncadd [#allocation3], 4294967168 }
  0x56   :  { %904 = dma.done.wait [#allocation6], 2048  }
  0x57   :  { %905 = vsyncadd [#allocation6], 4294965248 }
  0x58   :  { %906 = dma.done.wait [#allocation9], 2048  }
  0x59   :  { %907 = vsyncadd [#allocation9], 4294965248  ;;  %v917_v0 = vmov 0.0   ;;  %vm918_vm0 = vmmov 0   ;;  %v738_v1 = vld [vmem:[#allocation5] sm:$0xff]   ;;  %v739_v2 = vld [vmem:[#allocation5 + $0x8] sm:$0xff]  }
  0x5a   :  { %648 = vmatprep.subr.bf16.mxu0 %v917_v0  ;;  %664 = vmatprep.mubr.msk.bf16.mxu0 %vm918_vm0, %v917_v0  ;;  %v740_v3 = vld [vmem:[#allocation5 + $0x10] sm:$0xff]   ;;  %v746_v4 = vld [vmem:[#allocation7] sm:$0xff]   ;;  %v741_v5 = vld [vmem:[#allocation5 + $0x18] sm:$0xff]   ;;  %s919_s11 = smov [#allocation11]  }
  0x5b   :  { %668 = vmatprep.subr.bf16.mxu1 %v917_v0  ;;  %684 = vmatprep.mubr.msk.bf16.mxu1 %vm918_vm0, %v917_v0  ;;  %v747_v6 = vld [vmem:[#allocation7 + $0x8] sm:$0xff]   ;;  %v742_v7 = vld [vmem:[#allocation5 + $0x20] sm:$0xff]   ;;  %v748_v8 = vld [vmem:[#allocation7 + $0x10] sm:$0xff]   ;;  %s565_s12 = sshll.u32 %s919_s11, 4  ;;  %s566_s12 = int_to_ptr.vmem [resolvable:$true] %s565_s12 }
  0x5c   :  { %649 = vmatpush3.bf16.msra.mxu0 %v738_v1  ;;  %669 = vmatpush3.bf16.msra.mxu1 %v746_v4  ;;  %v743_v9 = vld [vmem:[#allocation5 + $0x28] sm:$0xff]   ;;  %v749_v10 = vld [vmem:[#allocation7 + $0x18] sm:$0xff]   ;;  %v744_v11 = vld [vmem:[#allocation5 + $0x30] sm:$0xff]   ;;  %p885_p13 = scmp.lt.s32.totalorder %s566_s12, %s566_s12 }
  0x5d   :  { %650 = vmatprep.subr.bf16.mxu0 %v917_v0  ;;  %670 = vmatprep.subr.bf16.mxu1 %v917_v0  ;;  %v750_v12 = vld [vmem:[#allocation7 + $0x20] sm:$0xff]   ;;  %v745_v13 = vld [vmem:[#allocation5 + $0x38] sm:$0xff]   ;;  %v751_v15 = vld [vmem:[#allocation7 + $0x28] sm:$0xff]  }
  0x5e   :  { %v100_v14 = vld [vmem:[#allocation2] sm:$0xff]  ;;  %v752_v17 = vld [vmem:[#allocation7 + $0x30] sm:$0xff]   ;;  %v754_v19 = vld [vmem:[#allocation8] sm:$0xff]  }
  0x5f   :  { %v101_v16 = vpack.c.bf16 %v100_v14, %v100_v14  ;;  %v753_v18 = vld [vmem:[#allocation7 + $0x38] sm:$0xff]   ;;  %v755_v20 = vld [vmem:[#allocation8 + $0x8] sm:$0xff]   ;;  %v756_v21 = vld [vmem:[#allocation8 + $0x10] sm:$0xff]  }
  0x60   :  { %651 = vmatpush3.bf16.msra.mxu0 %v739_v2  ;;  %671 = vmatpush3.bf16.msra.mxu1 %v747_v6  ;;  %v757_v22 = vld [vmem:[#allocation8 + $0x18] sm:$0xff]   ;;  %v758_v23 = vld [vmem:[#allocation8 + $0x20] sm:$0xff]   ;;  %v759_v24 = vld [vmem:[#allocation8 + $0x28] sm:$0xff]  }
  0x61   :  { %652 = vmatprep.subr.bf16.mxu0 %v917_v0  ;;  %672 = vmatprep.subr.bf16.mxu1 %v917_v0  ;;  %v576_v25 = vld [vmem:[%s1108_s2] ss:$0 sm:$0xff]  ;;  %v760_v34 = vld [vmem:[#allocation8 + $0x30] sm:$0xff]   ;;  %v762_v36 = vld [vmem:[#allocation10] sm:$0xff]  }
  0x62   :  { %v761_v35 = vld [vmem:[#allocation8 + $0x38] sm:$0xff]   ;;  %v763_v37 = vld [vmem:[#allocation10 + $0x8] sm:$0xff]   ;;  %v764_v38 = vld [vmem:[#allocation10 + $0x10] sm:$0xff]  }
  0x63   :  { %v765_v39 = vld [vmem:[#allocation10 + $0x18] sm:$0xff]   ;;  %v766_v40 = vld [vmem:[#allocation10 + $0x20] sm:$0xff]   ;;  %v767_v41 = vld [vmem:[#allocation10 + $0x28] sm:$0xff]  }
  0x64   :  { %653 = vmatpush3.bf16.msra.mxu0 %v740_v3  ;;  %673 = vmatpush3.bf16.msra.mxu1 %v748_v8  ;;  %v585_v42 = vld [vmem:[%s1110_s4] ss:$0 sm:$0xff]  ;;  %v768_v51 = vld [vmem:[#allocation10 + $0x30] sm:$0xff]  }
  0x65   :  { %654 = vmatprep.subr.bf16.mxu0 %v917_v0  ;;  %674 = vmatprep.subr.bf16.mxu1 %v917_v0  ;;  %v769_v52 = vld [vmem:[#allocation10 + $0x38] sm:$0xff]  }
  0x66   :  { %v594_v53 = vld [vmem:[%s1112_s6] ss:$0 sm:$0xff]  ;;  %s880_s6 = scalar_lea.vmem %s566_s12, 128 }
  0x67   :  { %v603_v62 = vld [vmem:[%s1114_s8] ss:$0 sm:$0xff]  ;;  %p881_p12 = scmp.ne.s32.totalorder %s566_s12, %s880_s6  ;;  %p886_p0 = scmp.lt.s32.totalorder %s880_s6, %s880_s6 }
  0x68   :  { %655 = vmatpush3.bf16.msra.mxu0 %v741_v5  ;;  %675 = vmatpush3.bf16.msra.mxu1 %v749_v10 }
  0x69   :  { %656 = vmatprep.subr.bf16.mxu0 %v917_v0  ;;  %676 = vmatprep.subr.bf16.mxu1 %v917_v0  ;;  %p887_p1 = por %p886_p0, %p885_p13 }
  0x6b   :  { %p888_p2 = pnand %p887_p1, %p881_p12 }
  0x6c   :  { %657 = vmatpush3.bf16.msra.mxu0 %v742_v7  ;;  %677 = vmatpush3.bf16.msra.mxu1 %v750_v12 }
  0x6d   :  { %658 = vmatprep.subr.bf16.mxu0 %v917_v0  ;;  %678 = vmatprep.subr.bf16.mxu1 %v917_v0 }
  0x70   :  { %659 = vmatpush3.bf16.msra.mxu0 %v743_v9  ;;  %679 = vmatpush3.bf16.msra.mxu1 %v751_v15 }
  0x71   :  { %660 = vmatprep.subr.bf16.mxu0 %v917_v0  ;;  %680 = vmatprep.subr.bf16.mxu1 %v917_v0 }
  0x74   :  { %661 = vmatpush3.bf16.msra.mxu0 %v744_v11  ;;  %681 = vmatpush3.bf16.msra.mxu1 %v752_v17 }
  0x75   :  { %662 = vmatprep.subr.bf16.mxu0 %v917_v0  ;;  %682 = vmatprep.subr.bf16.mxu1 %v917_v0 }
  0x78   :  { %663 = vmatpush3.bf16.msra.mxu0 %v745_v13  ;;  %683 = vmatpush3.bf16.msra.mxu1 %v753_v18 }
  0x79   :  { %688 = vmatprep.subr.bf16.mxu0 %v917_v0  ;;  %708 = vmatprep.subr.bf16.mxu1 %v917_v0 }
  0x7b   :  { %665 = vmatmul.mubr.bf16.vlgmr.msra.gmra.mrb[0].mxu0 %v101_v16 }
  0x7c   :  { %704 = vmatprep.mubr.msk.bf16.mxu0 %vm918_vm0, %v917_v0  ;;  %689 = vmatpush3.bf16.msra.mxu0 %v754_v19 }
  0x7d   :  { %690 = vmatprep.subr.bf16.mxu0 %v917_v0 }
  0x80   :  { %691 = vmatpush3.bf16.msra.mxu0 %v755_v20 }
  0x81   :  { %692 = vmatprep.subr.bf16.mxu0 %v917_v0 }
  0x84   :  { %693 = vmatpush3.bf16.msra.mxu0 %v756_v21 }
  0x85   :  { %694 = vmatprep.subr.bf16.mxu0 %v917_v0 }
  0x88   :  { %695 = vmatpush3.bf16.msra.mxu0 %v757_v22 }
  0x89   :  { %696 = vmatprep.subr.bf16.mxu0 %v917_v0 }
  0x8c   :  { %697 = vmatpush3.bf16.msra.mxu0 %v758_v23 }
  0x8d   :  { %698 = vmatprep.subr.bf16.mxu0 %v917_v0 }
  0x90   :  { %699 = vmatpush3.bf16.msra.mxu0 %v759_v24 }
  0x91   :  { %700 = vmatprep.subr.bf16.mxu0 %v917_v0 }
  0x94   :  { %701 = vmatpush3.bf16.msra.mxu0 %v760_v34 }
  0x95   :  { %702 = vmatprep.subr.bf16.mxu0 %v917_v0 }
  0x98   :  { %703 = vmatpush3.bf16.msra.mxu0 %v761_v35 }
 0x14e   :  { %v207_v26 = vpop.f32.mrb[0].mxu0 }
 0x14f   :  { %v208_v27 = vadd.f32 %v576_v25, %v207_v26  ;;  %v666_v28 = vpop.f32.mrb[1].mxu0 }
 0x150   :  { %v210_v29 = vpop.f32.mrb[2].mxu0 }
 0x151   :  { %vm213_vm1 = vcmp.gt.f32.partialorder %v208_v27, 0.0  ;;  %v214_v30 = vmul.f32 0.01, %v208_v27  ;;  %v667_v31 = vpop.f32.mrb[3].mxu0 }
 0x153   :  { %v215_v32 = vsel %vm213_vm1, %v208_v27, %v214_v30 }
 0x154   :  { %v216_v33 = vpack.c.bf16 %v215_v32, %v215_v32 }
 0x156   :  { %685 = vmatmul.mubr.bf16.vlgmr.msra.gmra.mrb[0].mxu1 %v216_v33 }
 0x157   :  { %724 = vmatprep.mubr.msk.bf16.mxu1 %vm918_vm0, %v917_v0  ;;  %709 = vmatpush3.bf16.msra.mxu1 %v762_v36 }
 0x158   :  { %710 = vmatprep.subr.bf16.mxu1 %v917_v0 }
 0x15b   :  { %711 = vmatpush3.bf16.msra.mxu1 %v763_v37 }
 0x15c   :  { %712 = vmatprep.subr.bf16.mxu1 %v917_v0 }
 0x15f   :  { %713 = vmatpush3.bf16.msra.mxu1 %v764_v38 }
 0x160   :  { %714 = vmatprep.subr.bf16.mxu1 %v917_v0 }
 0x163   :  { %715 = vmatpush3.bf16.msra.mxu1 %v765_v39 }
 0x164   :  { %716 = vmatprep.subr.bf16.mxu1 %v917_v0 }
 0x167   :  { %717 = vmatpush3.bf16.msra.mxu1 %v766_v40 }
 0x168   :  { %718 = vmatprep.subr.bf16.mxu1 %v917_v0 }
 0x16b   :  { %719 = vmatpush3.bf16.msra.mxu1 %v767_v41 }
 0x16c   :  { %720 = vmatprep.subr.bf16.mxu1 %v917_v0 }
 0x16f   :  { %721 = vmatpush3.bf16.msra.mxu1 %v768_v51 }
 0x170   :  { %722 = vmatprep.subr.bf16.mxu1 %v917_v0 }
 0x173   :  { %723 = vmatpush3.bf16.msra.mxu1 %v769_v52 }
 0x229   :  { %v322_v43 = vpop.f32.mrb[0].mxu1 }
 0x22a   :  { %v323_v44 = vadd.f32 %v585_v42, %v322_v43  ;;  %v686_v45 = vpop.f32.mrb[1].mxu1 }
 0x22b   :  { %v325_v46 = vpop.f32.mrb[2].mxu1 }
 0x22c   :  { %vm328_vm2 = vcmp.gt.f32.partialorder %v323_v44, 0.0  ;;  %v329_v47 = vmul.f32 0.01, %v323_v44  ;;  %v687_v48 = vpop.f32.mrb[3].mxu1 }
 0x22e   :  { %v330_v49 = vsel %vm328_vm2, %v323_v44, %v329_v47 }
 0x22f   :  { %v331_v50 = vpack.c.bf16 %v330_v49, %v330_v49 }
 0x231   :  { %705 = vmatmul.mubr.bf16.vlgmr.msra.gmra.mrb[4].mxu0 %v331_v50 }
 0x304   :  { %v437_v54 = vpop.f32.mrb[4].mxu0 }
 0x305   :  { %v438_v55 = vadd.f32 %v594_v53, %v437_v54  ;;  %v706_v56 = vpop.f32.mrb[5].mxu0 }
 0x306   :  { %v440_v57 = vpop.f32.mrb[6].mxu0 }
 0x307   :  { %vm443_vm3 = vcmp.gt.f32.partialorder %v438_v55, 0.0  ;;  %v444_v58 = vmul.f32 0.01, %v438_v55  ;;  %v707_v59 = vpop.f32.mrb[7].mxu0 }
 0x309   :  { %v445_v60 = vsel %vm443_vm3, %v438_v55, %v444_v58 }
 0x30a   :  { %v446_v61 = vpack.c.bf16 %v445_v60, %v445_v60 }
 0x30c   :  { %725 = vmatmul.mubr.bf16.vlgmr.msra.gmra.mrb[4].mxu1 %v446_v61 }
 0x3df   :  { %v552_v63 = vpop.f32.mrb[4].mxu1 }
 0x3e0   :  { %v553_v0 = vadd.f32 %v603_v62, %v552_v63  ;;  %v726_v1 = vpop.f32.mrb[5].mxu1 }
 0x3e1   :  { %v555_v2 = vpop.f32.mrb[6].mxu1 }
 0x3e2   :  { %558 = vst [vmem:[#allocation11] sm:$0xff] %v553_v0  ;;  %v727_v3 = vpop.f32.mrb[7].mxu1 }
 0x3e3   :  { %891 = shalt.err (!%p888_p2)
}
 0x3e4   :  { %s892_s8 = scalar_lea.hbm %s1115_s9, 128 }
 0x3e5   :  { %p893_p3 = scmp.ne.s32.totalorder %s1115_s9, %s892_s8  ;;  %p896_p4 = scmp.lt.u32.totalorder %s892_s8, %s1115_s9 }
 0x3e7   :  { %p898_p5 = pnand %p896_p4, %p893_p3 }
 0x3e9   :  { %901 = shalt.err (!%p898_p5)
}
 0x3ea   :  { %568 = dma.vmem_to_hbm [thread:$0]  %s566_s12, 128, %s1115_s9, [#allocation4]  }
 0x3eb   :  { %908 = dma.done.wait [#allocation4], 128  }
 0x3ec   :  { %909 = vsyncadd [#allocation4], 4294967168 }
 0x3ed   :  { %572 = vsyncpa [#allocation3], 1 }
 0x3ee   :  { %573 = vsyncpa [#allocation6], 1 }
 0x3ef   :  { %574 = vsyncpa [#allocation9], 1 }
 0x3f0   :  { %575 = vsyncpa [#allocation4], 1 }

</bundles_post_ra>
